<compile_context>
chip_gen: v7x
topology: tpu7x:2x2x1
jax: 0.10.0
libtpu: 0.0.40
codegen_flags: <defaults>
</compile_context>

<pallas_src>
import functools

import jax
import jax.numpy as jnp
from jax.experimental import pallas as pl
from jax.experimental.pallas import tpu as pltpu


# --------------------------------------------------------------------------
# One fused Pallas kernel:
#   (Linear + ConvT1 + bias + ReLU) matmul  ->  ConvT2 FMAs + bias + sigmoid
# --------------------------------------------------------------------------
def _decoder_fused_kernel(x_ref, wf_ref, bf_ref, w2_ref, b2_ref, o_ref,
                          *, n_c1, n_out):
    """
    x_ref  : (bt, z_dim)        VMEM  latent batch tile
    wf_ref : (z_dim, c1*n_out)  VMEM  fused Linear+ConvT1 weight, columns already
                                      replicated into flat-NCHW output order
    bf_ref : (1, c1*n_out)      VMEM  fused Linear+ConvT1 bias (same column order)
    w2_ref : (c1, n_out)        VMEM  pre-broadcast ConvT2 weight table
    b2_ref : (1, n_out)         VMEM  pre-broadcast ConvT2 bias
    o_ref  : (bt, n_out)        VMEM  o[b, co*Ho*Wo + oi*Wo + oj]   (flat NCHW)
    """
    # ---- stage 1: fused Linear + ConvT1 + bias + ReLU (single MXU matmul) ----
    h = jnp.dot(x_ref[...], wf_ref[...], preferred_element_type=jnp.float32)
    h = jnp.maximum(h + bf_ref[...], 0.0)                 # (bt, c1*n_out)

    # ---- stage 2: ConvT2 as c1 lane-dense VPU FMAs (K=16 too small for MXU),
    #      then ONE sigmoid and ONE unmasked wide store. -------------------
    acc = h[:, 0:n_out] * w2_ref[0:1, :] + b2_ref[...]
    for c in range(1, n_c1):
        acc = acc + h[:, c * n_out:(c + 1) * n_out] * w2_ref[c:c + 1, :]
    o_ref[...] = jax.nn.sigmoid(acc)


# --------------------------------------------------------------------------
# One-time parameter preparation (kept out of the traced hot path)
# --------------------------------------------------------------------------
def prepare_params(params, *, width_in, height_in):
    """Fold Linear + ConvT1 into one f32 weight/bias whose columns are laid out
    (and replicated) in the final flat-NCHW output order; build pre-broadcast
    ConvT2 weight/bias tables in the same column order."""
    wl, bl, w1, b1, w2, b2 = params
    z_dim = wl.shape[1]
    D2, D3 = width_in, height_in           # spatial dims of the (B,1,D2,D3) view
    c1 = w1.shape[1]
    c2 = w2.shape[1]
    n_out = c2 * (4 * D2) * (4 * D3)       # flat NCHW size of the final image
    f32 = jnp.float32

    # Column multi-index (row-major): (co, i, k1i, k2i, j, k1j, k2j)
    #   sizes                        : (c2, D2, 2,  2,  D3, 2,  2 )
    # which equals the flat NCHW index
    #   co*Ho*Wo + (2*(2i+k1i)+k2i)*Wo + (2*(2j+k1j)+k2j),  Ho=4*D2, Wo=4*D3.
    shp = (c2, D2, 2, 2, D3, 2, 2)

    wl_zij = wl.T.reshape(z_dim, D2, D3).astype(f32)      # [z, i, j]
    w1_0 = w1[0].astype(f32)                              # [c, k1i, k1j]

    # Fused Linear+ConvT1 weight core; independent of (co, k2i, k2j) -> broadcast.
    a = jnp.einsum("zij,ckl->zcikjl", wl_zij, w1_0)       # (z, c, i, k1i, j, k1j)
    a = a[:, :, None, :, :, None, :, :, None]             # insert co, k2i, k2j axes
    wf = jnp.broadcast_to(a, (z_dim, c1) + shp).reshape(z_dim, c1 * n_out)

    bl_ij = bl.reshape(D2, D3).astype(f32)
    bcore = (jnp.einsum("ij,ckl->cikjl", bl_ij, w1_0)
             + b1.astype(f32)[:, None, None, None, None])  # (c, i, k1i, j, k1j)
    bcore = bcore[:, None, :, :, None, :, :, None]
    bf = jnp.broadcast_to(bcore, (c1,) + shp).reshape(1, c1 * n_out)

    # Pre-broadcast ConvT2 tables; independent of (i, k1i, j, k1j) -> broadcast.
    w2c = w2.astype(f32)[:, :, None, None, :, None, None, :]   # (c, co,1,1,k2i,1,1,k2j)
    w2tab = jnp.broadcast_to(w2c, (c1,) + shp).reshape(c1, n_out)
    b2c = b2.astype(f32)[:, None, None, None, None, None, None]
    b2bc = jnp.broadcast_to(b2c, shp).reshape(1, n_out)

    return wf, bf, w2tab, b2bc


def _pick_batch_tile(b):
    """Full-batch block for small/odd B; multiple-of-8 tiles otherwise so the
    sublanes (and v7x's second TensorCore via the parallel grid axis) fill up."""
    if b % 8 != 0:
        return b
    bt = min(b, 128)
    while b % bt != 0:
        bt -= 8
    return bt


# --------------------------------------------------------------------------
# Forward pass
# --------------------------------------------------------------------------
def cnn_decoder1_forward(x, prep, *, width_in, height_in, num_channels_out):
    """x: (B, z_dim) float32 -> (B, C_out, 4*width_in, 4*height_in)."""
    wf, bf, w2tab, b2bc = prep
    B, z_dim = x.shape
    c1, n_out = w2tab.shape
    Ho, Wo = 4 * width_in, 4 * height_in
    Kc = wf.shape[1]                                   # c1 * n_out

    bt = _pick_batch_tile(B)
    grid = (B // bt,)

    kernel = functools.partial(_decoder_fused_kernel, n_c1=c1, n_out=n_out)

    o = pl.pallas_call(
        kernel,
        out_shape=jax.ShapeDtypeStruct((B, n_out), jnp.float32),
        grid=grid,
        in_specs=[
            pl.BlockSpec((bt, z_dim), lambda i: (i, 0)),     # latent batch tile
            pl.BlockSpec((z_dim, Kc), lambda i: (0, 0)),     # fused weight (pinned)
            pl.BlockSpec((1, Kc), lambda i: (0, 0)),         # fused bias   (pinned)
            pl.BlockSpec((c1, n_out), lambda i: (0, 0)),     # ConvT2 weight table
            pl.BlockSpec((1, n_out), lambda i: (0, 0)),      # ConvT2 bias row
        ],
        out_specs=pl.BlockSpec((bt, n_out), lambda i: (i, 0)),
        compiler_params=pltpu.CompilerParams(dimension_semantics=("parallel",)),
    )(x, wf, bf, w2tab, b2bc)

    # Kernel output is already in flat NCHW order: this reshape is a pure
    # layout-preserving view (no transpose, no extra data-movement dispatch).
    return o.reshape(B, num_channels_out, Ho, Wo)


# --------------------------------------------------------------------------
# Pure-JAX reference (same semantics as the PyTorch module) for verification
# --------------------------------------------------------------------------
def _ref_conv_transpose_2x2_s2(img, w, b):
    """img: (B, Cin, H, W); w: (Cin, Cout, 2, 2); b: (Cout,)."""
    Bn, Cin, H, W = img.shape
    Cout = w.shape[1]
    out = jnp.zeros((Bn, Cout, 2 * H, 2 * W), dtype=jnp.float32)
    for ki in range(2):
        for kj in range(2):
            contrib = jnp.einsum("bchw,co->bohw", img, w[:, :, ki, kj])
            out = out.at[:, :, ki::2, kj::2].set(contrib)
    return out + b[None, :, None, None]


def ref_forward(x, params, *, width_in, height_in):
    wl, bl, w1, b1, w2, b2 = params
    B = x.shape[0]
    y = x @ wl.T + bl
    img = y.reshape(B, 1, width_in, height_in)
    h = jax.nn.relu(_ref_conv_transpose_2x2_s2(img, w1, b1))
    o = jax.nn.sigmoid(_ref_conv_transpose_2x2_s2(h, w2, b2))
    return o


# --------------------------------------------------------------------------
if __name__ == "__main__":
    # Module hyper-params (small, consistent with CNNDecoder1)
    z_dim = 8
    image_width = 16
    image_height = 16
    grayscale = True
    num_channels_out = 2 if grayscale else 6
    width_in = image_width // 4
    height_in = image_height // 4
    B = 2

    key = jax.random.PRNGKey(0)
    k_in, k1, k2, k3, k4, k5, k6 = jax.random.split(key, 7)

    # Deterministic synthetic parameters (PyTorch-layout shapes)
    wl = jax.random.uniform(k1, (width_in * height_in, z_dim), jnp.float32, -0.3, 0.3)
    bl = jax.random.uniform(k2, (width_in * height_in,), jnp.float32, -0.3, 0.3)
    w1 = jax.random.uniform(k3, (1, 16, 2, 2), jnp.float32, -0.5, 0.5)          # ConvT(1,16,2,2)
    b1 = jax.random.uniform(k4, (16,), jnp.float32, -0.5, 0.5)
    w2 = jax.random.uniform(k5, (16, num_channels_out, 2, 2), jnp.float32, -0.25, 0.25)
    b2 = jax.random.uniform(k6, (num_channels_out,), jnp.float32, -0.25, 0.25)
    params = (wl, bl, w1, b1, w2, b2)

    x = jax.random.normal(k_in, (B, z_dim), dtype=jnp.float32)

    # One-time parameter prep (fused / replicated f32 tables), outside the hot path.
    prep = prepare_params(params, width_in=width_in, height_in=height_in)

    fwd = jax.jit(functools.partial(cnn_decoder1_forward,
                                    width_in=width_in, height_in=height_in,
                                    num_channels_out=num_channels_out))
    out = jax.block_until_ready(fwd(x, prep))

    expected_shape = (B, num_channels_out, image_width, image_height)
    assert out.shape == expected_shape, (out.shape, expected_shape)

    ref = ref_forward(x, params, width_in=width_in, height_in=height_in)
    assert jnp.allclose(out, ref, atol=1e-5, rtol=1e-5), "mismatch vs reference"

    print("KERNEL_OK")
</pallas_src>

<mosaic_0001>
module attributes {stable_mosaic.version = 11 : i64} {
  func.func @_decoder_fused_kernel(%arg0: i32, %arg1: memref<2x8xf32, #tpu.memory_space<vmem>>, %arg2: memref<8x8192xf32, #tpu.memory_space<vmem>>, %arg3: memref<1x8192xf32, #tpu.memory_space<vmem>>, %arg4: memref<16x512xf32, #tpu.memory_space<vmem>>, %arg5: memref<1x512xf32, #tpu.memory_space<vmem>>, %arg6: memref<2x512xf32, #tpu.memory_space<vmem>>) attributes {dimension_semantics = [#tpu.dimension_semantics<parallel>], iteration_bounds = array<i64: 1>, scalar_prefetch = 0 : i64, scratch_operands = 0 : i64, tpu.core_type = #tpu.core_type<tc>, window_params = [{transform_indices = @transform_0, window_bounds = array<i64: 2, 8>}, {pipeline_mode = #tpu.pipeline_mode<synchronous>, transform_indices = @transform_1, window_bounds = array<i64: 8, 8192>}, {pipeline_mode = #tpu.pipeline_mode<synchronous>, transform_indices = @transform_2, window_bounds = array<i64: 1, 8192>}, {pipeline_mode = #tpu.pipeline_mode<synchronous>, transform_indices = @transform_3, window_bounds = array<i64: 16, 512>}, {pipeline_mode = #tpu.pipeline_mode<synchronous>, transform_indices = @transform_4, window_bounds = array<i64: 1, 512>}, {transform_indices = @transform_5, window_bounds = array<i64: 2, 512>}]} {
    %c0 = arith.constant 0 : index
    %c0_0 = arith.constant 0 : index
    %0 = vector.load %arg1[%c0, %c0_0] : memref<2x8xf32, #tpu.memory_space<vmem>>, vector<2x8xf32>
    %c0_1 = arith.constant 0 : index
    %c0_2 = arith.constant 0 : index
    %1 = vector.load %arg2[%c0_1, %c0_2] : memref<8x8192xf32, #tpu.memory_space<vmem>>, vector<8x8192xf32>
    %cst = arith.constant dense<0.000000e+00> : vector<2x8192xf32>
    %2 = tpu.matmul %0, %1, %cst {dimension_numbers = #tpu.dot_dimension_numbers<[1], [0], [0], [1], [0, 0, 1, 1], [], []>} : vector<2x8xf32>, vector<8x8192xf32>, vector<2x8192xf32> -> vector<2x8192xf32>
    %c0_3 = arith.constant 0 : index
    %c0_4 = arith.constant 0 : index
    %3 = vector.load %arg3[%c0_3, %c0_4] : memref<1x8192xf32, #tpu.memory_space<vmem>>, vector<1x8192xf32>
    %4 = vector.broadcast %3 : vector<1x8192xf32> to vector<2x8192xf32>
    %5 = arith.addf %2, %4 : vector<2x8192xf32>
    %cst_5 = arith.constant 0.000000e+00 : f32
    %6 = vector.broadcast %cst_5 : f32 to vector<2x8192xf32>
    %7 = arith.maximumf %5, %6 : vector<2x8192xf32>
    %8 = vector.extract_strided_slice %7 {offsets = [0, 0], sizes = [2, 512], strides = [1, 1]} : vector<2x8192xf32> to vector<2x512xf32>
    %c0_6 = arith.constant 0 : index
    %c0_7 = arith.constant 0 : index
    %9 = vector.load %arg4[%c0_6, %c0_7] : memref<16x512xf32, #tpu.memory_space<vmem>>, vector<1x512xf32>
    %10 = vector.broadcast %9 : vector<1x512xf32> to vector<2x512xf32>
    %11 = arith.mulf %8, %10 : vector<2x512xf32>
    %c0_8 = arith.constant 0 : index
    %c0_9 = arith.constant 0 : index
    %12 = vector.load %arg5[%c0_8, %c0_9] : memref<1x512xf32, #tpu.memory_space<vmem>>, vector<1x512xf32>
    %13 = vector.broadcast %12 : vector<1x512xf32> to vector<2x512xf32>
    %14 = arith.addf %11, %13 : vector<2x512xf32>
    %15 = vector.extract_strided_slice %7 {offsets = [0, 512], sizes = [2, 512], strides = [1, 1]} : vector<2x8192xf32> to vector<2x512xf32>
    %c1 = arith.constant 1 : index
    %c0_10 = arith.constant 0 : index
    %16 = vector.load %arg4[%c1, %c0_10] : memref<16x512xf32, #tpu.memory_space<vmem>>, vector<1x512xf32>
    %17 = vector.broadcast %16 : vector<1x512xf32> to vector<2x512xf32>
    %18 = arith.mulf %15, %17 : vector<2x512xf32>
    %19 = arith.addf %14, %18 : vector<2x512xf32>
    %20 = vector.extract_strided_slice %7 {offsets = [0, 1024], sizes = [2, 512], strides = [1, 1]} : vector<2x8192xf32> to vector<2x512xf32>
    %c2 = arith.constant 2 : index
    %c0_11 = arith.constant 0 : index
    %21 = vector.load %arg4[%c2, %c0_11] : memref<16x512xf32, #tpu.memory_space<vmem>>, vector<1x512xf32>
    %22 = vector.broadcast %21 : vector<1x512xf32> to vector<2x512xf32>
    %23 = arith.mulf %20, %22 : vector<2x512xf32>
    %24 = arith.addf %19, %23 : vector<2x512xf32>
    %25 = vector.extract_strided_slice %7 {offsets = [0, 1536], sizes = [2, 512], strides = [1, 1]} : vector<2x8192xf32> to vector<2x512xf32>
    %c3 = arith.constant 3 : index
    %c0_12 = arith.constant 0 : index
    %26 = vector.load %arg4[%c3, %c0_12] : memref<16x512xf32, #tpu.memory_space<vmem>>, vector<1x512xf32>
    %27 = vector.broadcast %26 : vector<1x512xf32> to vector<2x512xf32>
    %28 = arith.mulf %25, %27 : vector<2x512xf32>
    %29 = arith.addf %24, %28 : vector<2x512xf32>
    %30 = vector.extract_strided_slice %7 {offsets = [0, 2048], sizes = [2, 512], strides = [1, 1]} : vector<2x8192xf32> to vector<2x512xf32>
    %c4 = arith.constant 4 : index
    %c0_13 = arith.constant 0 : index
    %31 = vector.load %arg4[%c4, %c0_13] : memref<16x512xf32, #tpu.memory_space<vmem>>, vector<1x512xf32>
    %32 = vector.broadcast %31 : vector<1x512xf32> to vector<2x512xf32>
    %33 = arith.mulf %30, %32 : vector<2x512xf32>
    %34 = arith.addf %29, %33 : vector<2x512xf32>
    %35 = vector.extract_strided_slice %7 {offsets = [0, 2560], sizes = [2, 512], strides = [1, 1]} : vector<2x8192xf32> to vector<2x512xf32>
    %c5 = arith.constant 5 : index
    %c0_14 = arith.constant 0 : index
    %36 = vector.load %arg4[%c5, %c0_14] : memref<16x512xf32, #tpu.memory_space<vmem>>, vector<1x512xf32>
    %37 = vector.broadcast %36 : vector<1x512xf32> to vector<2x512xf32>
    %38 = arith.mulf %35, %37 : vector<2x512xf32>
    %39 = arith.addf %34, %38 : vector<2x512xf32>
    %40 = vector.extract_strided_slice %7 {offsets = [0, 3072], sizes = [2, 512], strides = [1, 1]} : vector<2x8192xf32> to vector<2x512xf32>
    %c6 = arith.constant 6 : index
    %c0_15 = arith.constant 0 : index
    %41 = vector.load %arg4[%c6, %c0_15] : memref<16x512xf32, #tpu.memory_space<vmem>>, vector<1x512xf32>
    %42 = vector.broadcast %41 : vector<1x512xf32> to vector<2x512xf32>
    %43 = arith.mulf %40, %42 : vector<2x512xf32>
    %44 = arith.addf %39, %43 : vector<2x512xf32>
    %45 = vector.extract_strided_slice %7 {offsets = [0, 3584], sizes = [2, 512], strides = [1, 1]} : vector<2x8192xf32> to vector<2x512xf32>
    %c7 = arith.constant 7 : index
    %c0_16 = arith.constant 0 : index
    %46 = vector.load %arg4[%c7, %c0_16] : memref<16x512xf32, #tpu.memory_space<vmem>>, vector<1x512xf32>
    %47 = vector.broadcast %46 : vector<1x512xf32> to vector<2x512xf32>
    %48 = arith.mulf %45, %47 : vector<2x512xf32>
    %49 = arith.addf %44, %48 : vector<2x512xf32>
    %50 = vector.extract_strided_slice %7 {offsets = [0, 4096], sizes = [2, 512], strides = [1, 1]} : vector<2x8192xf32> to vector<2x512xf32>
    %c8 = arith.constant 8 : index
    %c0_17 = arith.constant 0 : index
    %51 = vector.load %arg4[%c8, %c0_17] : memref<16x512xf32, #tpu.memory_space<vmem>>, vector<1x512xf32>
    %52 = vector.broadcast %51 : vector<1x512xf32> to vector<2x512xf32>
    %53 = arith.mulf %50, %52 : vector<2x512xf32>
    %54 = arith.addf %49, %53 : vector<2x512xf32>
    %55 = vector.extract_strided_slice %7 {offsets = [0, 4608], sizes = [2, 512], strides = [1, 1]} : vector<2x8192xf32> to vector<2x512xf32>
    %c9 = arith.constant 9 : index
    %c0_18 = arith.constant 0 : index
    %56 = vector.load %arg4[%c9, %c0_18] : memref<16x512xf32, #tpu.memory_space<vmem>>, vector<1x512xf32>
    %57 = vector.broadcast %56 : vector<1x512xf32> to vector<2x512xf32>
    %58 = arith.mulf %55, %57 : vector<2x512xf32>
    %59 = arith.addf %54, %58 : vector<2x512xf32>
    %60 = vector.extract_strided_slice %7 {offsets = [0, 5120], sizes = [2, 512], strides = [1, 1]} : vector<2x8192xf32> to vector<2x512xf32>
    %c10 = arith.constant 10 : index
    %c0_19 = arith.constant 0 : index
    %61 = vector.load %arg4[%c10, %c0_19] : memref<16x512xf32, #tpu.memory_space<vmem>>, vector<1x512xf32>
    %62 = vector.broadcast %61 : vector<1x512xf32> to vector<2x512xf32>
    %63 = arith.mulf %60, %62 : vector<2x512xf32>
    %64 = arith.addf %59, %63 : vector<2x512xf32>
    %65 = vector.extract_strided_slice %7 {offsets = [0, 5632], sizes = [2, 512], strides = [1, 1]} : vector<2x8192xf32> to vector<2x512xf32>
    %c11 = arith.constant 11 : index
    %c0_20 = arith.constant 0 : index
    %66 = vector.load %arg4[%c11, %c0_20] : memref<16x512xf32, #tpu.memory_space<vmem>>, vector<1x512xf32>
    %67 = vector.broadcast %66 : vector<1x512xf32> to vector<2x512xf32>
    %68 = arith.mulf %65, %67 : vector<2x512xf32>
    %69 = arith.addf %64, %68 : vector<2x512xf32>
    %70 = vector.extract_strided_slice %7 {offsets = [0, 6144], sizes = [2, 512], strides = [1, 1]} : vector<2x8192xf32> to vector<2x512xf32>
    %c12 = arith.constant 12 : index
    %c0_21 = arith.constant 0 : index
    %71 = vector.load %arg4[%c12, %c0_21] : memref<16x512xf32, #tpu.memory_space<vmem>>, vector<1x512xf32>
    %72 = vector.broadcast %71 : vector<1x512xf32> to vector<2x512xf32>
    %73 = arith.mulf %70, %72 : vector<2x512xf32>
    %74 = arith.addf %69, %73 : vector<2x512xf32>
    %75 = vector.extract_strided_slice %7 {offsets = [0, 6656], sizes = [2, 512], strides = [1, 1]} : vector<2x8192xf32> to vector<2x512xf32>
    %c13 = arith.constant 13 : index
    %c0_22 = arith.constant 0 : index
    %76 = vector.load %arg4[%c13, %c0_22] : memref<16x512xf32, #tpu.memory_space<vmem>>, vector<1x512xf32>
    %77 = vector.broadcast %76 : vector<1x512xf32> to vector<2x512xf32>
    %78 = arith.mulf %75, %77 : vector<2x512xf32>
    %79 = arith.addf %74, %78 : vector<2x512xf32>
    %80 = vector.extract_strided_slice %7 {offsets = [0, 7168], sizes = [2, 512], strides = [1, 1]} : vector<2x8192xf32> to vector<2x512xf32>
    %c14 = arith.constant 14 : index
    %c0_23 = arith.constant 0 : index
    %81 = vector.load %arg4[%c14, %c0_23] : memref<16x512xf32, #tpu.memory_space<vmem>>, vector<1x512xf32>
    %82 = vector.broadcast %81 : vector<1x512xf32> to vector<2x512xf32>
    %83 = arith.mulf %80, %82 : vector<2x512xf32>
    %84 = arith.addf %79, %83 : vector<2x512xf32>
    %85 = vector.extract_strided_slice %7 {offsets = [0, 7680], sizes = [2, 512], strides = [1, 1]} : vector<2x8192xf32> to vector<2x512xf32>
    %c15 = arith.constant 15 : index
    %c0_24 = arith.constant 0 : index
    %86 = vector.load %arg4[%c15, %c0_24] : memref<16x512xf32, #tpu.memory_space<vmem>>, vector<1x512xf32>
    %87 = vector.broadcast %86 : vector<1x512xf32> to vector<2x512xf32>
    %88 = arith.mulf %85, %87 : vector<2x512xf32>
    %89 = arith.addf %84, %88 : vector<2x512xf32>
    %90 = arith.negf %89 : vector<2x512xf32>
    %91 = math.exp %90 : vector<2x512xf32>
    %cst_25 = arith.constant 1.000000e+00 : f32
    %92 = vector.broadcast %cst_25 : f32 to vector<2x512xf32>
    %93 = arith.addf %92, %91 : vector<2x512xf32>
    %94 = arith.divf %92, %93 : vector<2x512xf32>
    %c0_26 = arith.constant 0 : index
    %c0_27 = arith.constant 0 : index
    %95 = vector.load %arg6[%c0_26, %c0_27] : memref<2x512xf32, #tpu.memory_space<vmem>>, vector<2x512xf32>
    tpu.vector_store %arg6[%c0_26, %c0_27], %94 {strides = array<i32>} : memref<2x512xf32, #tpu.memory_space<vmem>>, vector<2x512xf32>,
    return
  }
  func.func @transform_0(%arg0: i32) -> (i32, i32) {
    %c0_i32 = arith.constant 0 : i32
    %c0_i32_0 = arith.constant 0 : i32
    return %arg0, %c0_i32 : i32, i32
  }
  func.func @transform_1(%arg0: i32) -> (i32, i32) {
    %c0_i32 = arith.constant 0 : i32
    %c0_i32_0 = arith.constant 0 : i32
    %c0_i32_1 = arith.constant 0 : i32
    return %c0_i32, %c0_i32_0 : i32, i32
  }
  func.func @transform_2(%arg0: i32) -> (i32, i32) {
    %c0_i32 = arith.constant 0 : i32
    %c0_i32_0 = arith.constant 0 : i32
    %c0_i32_1 = arith.constant 0 : i32
    return %c0_i32, %c0_i32_0 : i32, i32
  }
  func.func @transform_3(%arg0: i32) -> (i32, i32) {
    %c0_i32 = arith.constant 0 : i32
    %c0_i32_0 = arith.constant 0 : i32
    %c0_i32_1 = arith.constant 0 : i32
    return %c0_i32, %c0_i32_0 : i32, i32
  }
  func.func @transform_4(%arg0: i32) -> (i32, i32) {
    %c0_i32 = arith.constant 0 : i32
    %c0_i32_0 = arith.constant 0 : i32
    %c0_i32_1 = arith.constant 0 : i32
    return %c0_i32, %c0_i32_0 : i32, i32
  }
  func.func @transform_5(%arg0: i32) -> (i32, i32) {
    %c0_i32 = arith.constant 0 : i32
    %c0_i32_0 = arith.constant 0 : i32
    return %arg0, %c0_i32 : i32, i32
  }
}

</mosaic_0001>

<bundles_post_ra>
// kernel: cnn_decoder1_forward.1
= control target key start
LH: loop header
LB: loop body
LE: loop exit
PB: predicated region body
PF: predicated region fallthrough
CT: control target
= control target key end

     0   :  { %10 = vsyncpa [#allocation3], 0  ;;  %s4469_s0 = inlined_call_operand.hbm [shape: f32[2,8], index: 0, kind: input, shape index: {}]   ;;  %s4470_s1 = inlined_call_operand.hbm [shape: f32[8,8192], index: 1, kind: input, shape index: {}]   ;;  %s4471_s2 = inlined_call_operand.hbm [shape: f32[1,8192], index: 2, kind: input, shape index: {}]   ;;  %s4472_s3 = inlined_call_operand.hbm [shape: f32[16,512], index: 3, kind: input, shape index: {}]   ;;  %s4473_s4 = inlined_call_operand.vmem [shape: f32[1,512], index: 4, kind: input, shape index: {}]   ;;  %s4474_s5 = inlined_call_operand.vmem [shape: f32[2,512], index: 5, kind: output, shape index: {}]  }
   0x1   :  { %11 = vsyncpa [#allocation5], 0 }
   0x2   :  { %12 = vsyncpa [#allocation8], 0  ;;  %s3535_s18 = smov [#allocation4]   ;;  %s3536_s20 = smov [#allocation2]  }
   0x3   :  { %s29_s19 = sshll.u32 %s3535_s18, 4  ;;  %s19_s21 = sshll.u32 %s3536_s20, 4  ;;  %s30_s19 = int_to_ptr.vmem [resolvable:$true] %s29_s19  ;;  %s20_s21 = int_to_ptr.vmem [resolvable:$true] %s19_s21 }
   0x4   :  { %s3441_s24 = scalar_lea.hbm %s4470_s1, 8192 }
   0x5   :  { %p3442_p0 = scmp.ne.s32.totalorder %s4470_s1, %s3441_s24  ;;  %p3445_p1 = scmp.lt.u32.totalorder %s3441_s24, %s4470_s1 }
   0x7   :  { %p3447_p2 = pnand %p3445_p1, %p3442_p0 }
   0x9   :  { %3450 = shalt.err (!%p3447_p2)
}
   0xa   :  { %s3451_s29 = scalar_lea.vmem %s30_s19, 8192  ;;  %p3456_p4 = scmp.lt.s32.totalorder %s30_s19, %s30_s19 }
   0xb   :  { %p3452_p3 = scmp.ne.s32.totalorder %s30_s19, %s3451_s29  ;;  %p3457_p5 = scmp.lt.s32.totalorder %s3451_s29, %s3451_s29 }
   0xd   :  { %p3458_p6 = por %p3457_p5, %p3456_p4 }
   0xf   :  { %p3459_p7 = pnand %p3458_p6, %p3452_p3 }
  0x11   :  { %3462 = shalt.err (!%p3459_p7)
}
  0x12   :  { %32 = dma.hbm_to_vmem [thread:$0]  %s4470_s1, 8192, %s30_s19, [#allocation5]  }
  0x13   :  { %s3463_s9 = scalar_lea.hbm %s4469_s0, 32 }
  0x14   :  { %p3464_p8 = scmp.ne.s32.totalorder %s4469_s0, %s3463_s9  ;;  %p3467_p9 = scmp.lt.u32.totalorder %s3463_s9, %s4469_s0 }
  0x16   :  { %p3469_p10 = pnand %p3467_p9, %p3464_p8 }
  0x18   :  { %3472 = shalt.err (!%p3469_p10)
}
  0x19   :  { %s3473_s14 = scalar_lea.vmem %s20_s21, 32  ;;  %p3478_p12 = scmp.lt.s32.totalorder %s20_s21, %s20_s21 }
  0x1a   :  { %p3474_p11 = scmp.ne.s32.totalorder %s20_s21, %s3473_s14  ;;  %p3479_p13 = scmp.lt.s32.totalorder %s3473_s14, %s3473_s14 }
  0x1c   :  { %p3480_p0 = por %p3479_p13, %p3478_p12 }
  0x1e   :  { %p3481_p1 = pnand %p3480_p0, %p3474_p11 }
  0x20   :  { %3484 = shalt.err (!%p3481_p1)
}
  0x21   :  { %22 = dma.hbm_to_vmem [thread:$0]  %s4469_s0, 32, %s20_s21, [#allocation3]  }
  0x22   :  { %s3537_s16 = smov [#allocation6]   ;;  %s3538_s18 = smov [#allocation7]  }
  0x23   :  { %s39_s17 = sshll.u32 %s3537_s16, 4  ;;  %s48_s19 = sshll.u32 %s3538_s18, 4  ;;  %s40_s17 = int_to_ptr.vmem [resolvable:$true] %s39_s17  ;;  %s3597_s19 = int_to_ptr.vmem [resolvable:$true] %s48_s19 }
  0x24   :  { %s3485_s23 = scalar_lea.hbm %s4471_s2, 1024 }
  0x25   :  { %p3486_p2 = scmp.ne.s32.totalorder %s4471_s2, %s3485_s23  ;;  %p3489_p3 = scmp.lt.u32.totalorder %s3485_s23, %s4471_s2 }
  0x27   :  { %p3491_p4 = pnand %p3489_p3, %p3486_p2 }
  0x29   :  { %3494 = shalt.err (!%p3491_p4)
}
  0x2a   :  { %s3495_s0 = scalar_lea.vmem %s40_s17, 1024  ;;  %p3500_p6 = scmp.lt.s32.totalorder %s40_s17, %s40_s17 }
  0x2b   :  { %p3496_p5 = scmp.ne.s32.totalorder %s40_s17, %s3495_s0  ;;  %p3501_p7 = scmp.lt.s32.totalorder %s3495_s0, %s3495_s0 }
  0x2d   :  { %p3502_p8 = por %p3501_p7, %p3500_p6 }
  0x2f   :  { %p3503_p9 = pnand %p3502_p8, %p3496_p5 }
  0x31   :  { %3506 = shalt.err (!%p3503_p9)
}
  0x32   :  { %42 = dma.hbm_to_vmem [thread:$0]  %s4471_s2, 1024, %s40_s17, [#allocation5]  }
  0x33   :  { %s3507_s6 = scalar_lea.hbm %s4472_s3, 1024 }
  0x34   :  { %p3508_p10 = scmp.ne.s32.totalorder %s4472_s3, %s3507_s6  ;;  %p3511_p11 = scmp.lt.u32.totalorder %s3507_s6, %s4472_s3 }
  0x36   :  { %p3513_p12 = pnand %p3511_p11, %p3508_p10 }
  0x38   :  { %3516 = shalt.err (!%p3513_p12)
}
  0x39   :  { %s3517_s11 = scalar_lea.vmem %s3597_s19, 1024  ;;  %p3522_p0 = scmp.lt.s32.totalorder %s3597_s19, %s3597_s19 }
  0x3a   :  { %p3518_p13 = scmp.ne.s32.totalorder %s3597_s19, %s3517_s11  ;;  %p3523_p1 = scmp.lt.s32.totalorder %s3517_s11, %s3517_s11 }
  0x3c   :  { %p3524_p2 = por %p3523_p1, %p3522_p0 }
  0x3e   :  { %p3525_p3 = pnand %p3524_p2, %p3518_p13 }
  0x40   :  { %3528 = shalt.err (!%p3525_p3)
}
  0x41   :  { %s3539_s2 = smov 512   ;;  %s3540_s12 = smov 32  }
  0x42   :  { %54 = dma.hbm_to_vmem [thread:$0]  %s4472_s3, 1024, %s3597_s19, [#allocation8], %s3539_s2, %s3539_s2, %s3540_s12  }
  0x43   :  { %3529 = dma.done.wait [#allocation3], 32  }
  0x44   :  { %3530 = vsyncadd [#allocation3], 4294967264 }
  0x45   :  { %3531 = dma.done.wait [#allocation5], 9216  }
  0x46   :  { %3532 = vsyncadd [#allocation5], 4294958080 }
  0x47   :  { %3533 = dma.done.wait [#allocation8], 1024  }
  0x48   :  { %3534 = vsyncadd [#allocation8], 4294966272  ;;  %v3541_v0 = vmov 0.0   ;;  %v71_v1 = vld [vmem:[#allocation4 + $0x8] sm:$0xff]  ;;  %v73_v2 = vld [vmem:[#allocation4 + $0x18] sm:$0xff]  ;;  %vm470_vm0 = vcmask 64512  }
  0x49   :  { %538 = vmatprep.mubr.f32.mxu0 %v3541_v0  ;;  %609 = vmatprep.mubr.f32.mxu1 %v3541_v0  ;;  %v70_v3 = vld [vmem:[#allocation4] sm:$0xff]  ;;  %v72_v4 = vld [vmem:[#allocation4 + $0x10] sm:$0xff]  ;;  %v3630_v5 = vld [vmem:[#allocation2] sm:$0x3] }
  0x4a   :  { %474 = vmatprep.subr.mxu0 %v71_v1  ;;  %545 = vmatprep.subr.mxu1 %v73_v2  ;;  %v75_v6 = vld [vmem:[#allocation4 + $0x28] sm:$0xff]  ;;  %v77_v7 = vld [vmem:[#allocation4 + $0x38] sm:$0xff]  ;;  %v74_v8 = vld [vmem:[#allocation4 + $0x20] sm:$0xff] }
  0x4b   :  { %475 = vmatpush1.msra.mxu0 %v70_v3  ;;  %546 = vmatpush1.msra.mxu1 %v72_v4  ;;  %v76_v9 = vld [vmem:[#allocation4 + $0x30] sm:$0xff]  ;;  %v79_v10 = vld [vmem:[#allocation4 + $0x48] sm:$0xff]  ;;  %v81_v11 = vld [vmem:[#allocation4 + $0x58] sm:$0xff]  ;;  %v150_v3 = vlaneseq }
  0x4c   :  { %3381 = vmatmul.mubr.msk.f32.vlgmr.msra.gmra.mrb[0].mxu0 %vm470_vm0, %v3630_v5  ;;  %3382 = vmatmul.mubr.msk.f32.vlgmr.msra.gmra.mrb[0].mxu1 %vm470_vm0, %v3630_v5  ;;  %v78_v12 = vld [vmem:[#allocation4 + $0x40] sm:$0xff]  ;;  %v80_v13 = vld [vmem:[#allocation4 + $0x50] sm:$0xff]  ;;  %v83_v14 = vld [vmem:[#allocation4 + $0x68] sm:$0xff] }
  0x4d   :  { %616 = vmatprep.subr.mxu0 %v75_v6  ;;  %687 = vmatprep.subr.mxu1 %v77_v7  ;;  %v85_v15 = vld [vmem:[#allocation4 + $0x78] sm:$0xff]  ;;  %v82_v16 = vld [vmem:[#allocation4 + $0x60] sm:$0xff]  ;;  %v84_v17 = vld [vmem:[#allocation4 + $0x70] sm:$0xff]  ;;  %v3726_v4 = vshrl.u32 %v150_v3, 7 }
  0x4e   :  { %617 = vmatpush1.msra.mxu0 %v74_v8  ;;  %688 = vmatpush1.msra.mxu1 %v76_v9  ;;  %v87_v18 = vld [vmem:[#allocation4 + $0x88] sm:$0xff]  ;;  %v89_v19 = vld [vmem:[#allocation4 + $0x98] sm:$0xff]  ;;  %v86_v20 = vld [vmem:[#allocation4 + $0x80] sm:$0xff] }
  0x4f   :  { %680 = vmatprep.mubr.f32.mxu0 %v3541_v0  ;;  %751 = vmatprep.mubr.f32.mxu1 %v3541_v0  ;;  %v88_v21 = vld [vmem:[#allocation4 + $0x90] sm:$0xff]  ;;  %v91_v22 = vld [vmem:[#allocation4 + $0xa8] sm:$0xff]  ;;  %v93_v23 = vld [vmem:[#allocation4 + $0xb8] sm:$0xff]  ;;  %v3729_v6 = vsub.s32 0, %v3726_v4  ;;  %v3732_v7 = vsub.s32 2, %v3726_v4  ;;  %v3735_v8 = vsub.s32 1, %v3726_v4 }
  0x50   :  { %3383 = vmatmul.mubr.msk.f32.vlgmr.msra.gmra.mrb[2].mxu0 %vm470_vm0, %v3630_v5  ;;  %3384 = vmatmul.mubr.msk.f32.vlgmr.msra.gmra.mrb[2].mxu1 %vm470_vm0, %v3630_v5  ;;  %v90_v24 = vld [vmem:[#allocation4 + $0xa0] sm:$0xff]  ;;  %v92_v25 = vld [vmem:[#allocation4 + $0xb0] sm:$0xff]  ;;  %v95_v26 = vld [vmem:[#allocation4 + $0xc8] sm:$0xff] }
  0x51   :  { %758 = vmatprep.subr.mxu0 %v79_v10  ;;  %829 = vmatprep.subr.mxu1 %v81_v11  ;;  %v97_v27 = vld [vmem:[#allocation4 + $0xd8] sm:$0xff]  ;;  %v94_v28 = vld [vmem:[#allocation4 + $0xc0] sm:$0xff]  ;;  %v96_v29 = vld [vmem:[#allocation4 + $0xd0] sm:$0xff]  ;;  %v3743_v10 = vsub.s32 4, %v3726_v4 }
  0x52   :  { %759 = vmatpush1.msra.mxu0 %v78_v12  ;;  %830 = vmatpush1.msra.mxu1 %v80_v13  ;;  %v99_v30 = vld [vmem:[#allocation4 + $0xe8] sm:$0xff]  ;;  %v101_v31 = vld [vmem:[#allocation4 + $0xf8] sm:$0xff]  ;;  %v98_v32 = vld [vmem:[#allocation4 + $0xe0] sm:$0xff]  ;;  %v3751_v12 = vsub.s32 5, %v3726_v4  ;;  %v3754_v13 = vsub.s32 7, %v3726_v4 }
  0x53   :  { %822 = vmatprep.mubr.f32.mxu0 %v3541_v0  ;;  %893 = vmatprep.mubr.f32.mxu1 %v3541_v0  ;;  %v100_v33 = vld [vmem:[#allocation4 + $0xf0] sm:$0xff]  ;;  %v103_v34 = vld [vmem:[#allocation4 + $0x108] sm:$0xff]  ;;  %v105_v35 = vld [vmem:[#allocation4 + $0x118] sm:$0xff] }
  0x54   :  { %3385 = vmatmul.mubr.msk.f32.vlgmr.msra.gmra.mrb[4].mxu0 %vm470_vm0, %v3630_v5  ;;  %3386 = vmatmul.mubr.msk.f32.vlgmr.msra.gmra.mrb[4].mxu1 %vm470_vm0, %v3630_v5  ;;  %v102_v36 = vld [vmem:[#allocation4 + $0x100] sm:$0xff]  ;;  %v104_v37 = vld [vmem:[#allocation4 + $0x110] sm:$0xff]  ;;  %v107_v38 = vld [vmem:[#allocation4 + $0x128] sm:$0xff] }
  0x55   :  { %900 = vmatprep.subr.mxu0 %v83_v14  ;;  %971 = vmatprep.subr.mxu1 %v85_v15  ;;  %v109_v39 = vld [vmem:[#allocation4 + $0x138] sm:$0xff]  ;;  %v106_v40 = vld [vmem:[#allocation4 + $0x120] sm:$0xff]  ;;  %v108_v41 = vld [vmem:[#allocation4 + $0x130] sm:$0xff] }
  0x56   :  { %901 = vmatpush1.msra.mxu0 %v82_v16  ;;  %972 = vmatpush1.msra.mxu1 %v84_v17  ;;  %v111_v42 = vld [vmem:[#allocation4 + $0x148] sm:$0xff]  ;;  %v113_v43 = vld [vmem:[#allocation4 + $0x158] sm:$0xff]  ;;  %v110_v44 = vld [vmem:[#allocation4 + $0x140] sm:$0xff] }
  0x57   :  { %964 = vmatprep.mubr.f32.mxu0 %v3541_v0  ;;  %1035 = vmatprep.mubr.f32.mxu1 %v3541_v0  ;;  %v112_v45 = vld [vmem:[#allocation4 + $0x150] sm:$0xff]  ;;  %v115_v46 = vld [vmem:[#allocation4 + $0x168] sm:$0xff]  ;;  %v117_v47 = vld [vmem:[#allocation4 + $0x178] sm:$0xff] }
  0x58   :  { %3387 = vmatmul.mubr.msk.f32.vlgmr.msra.gmra.mrb[6].mxu0 %vm470_vm0, %v3630_v5  ;;  %3388 = vmatmul.mubr.msk.f32.vlgmr.msra.gmra.mrb[6].mxu1 %vm470_vm0, %v3630_v5  ;;  %v114_v48 = vld [vmem:[#allocation4 + $0x160] sm:$0xff]  ;;  %v116_v49 = vld [vmem:[#allocation4 + $0x170] sm:$0xff]  ;;  %v119_v50 = vld [vmem:[#allocation4 + $0x188] sm:$0xff] }
  0x59   :  { %1042 = vmatprep.subr.mxu0 %v87_v18  ;;  %1113 = vmatprep.subr.mxu1 %v89_v19  ;;  %v121_v51 = vld [vmem:[#allocation4 + $0x198] sm:$0xff]  ;;  %v118_v52 = vld [vmem:[#allocation4 + $0x180] sm:$0xff]  ;;  %v120_v53 = vld [vmem:[#allocation4 + $0x190] sm:$0xff] }
  0x5a   :  { %1043 = vmatpush1.msra.mxu0 %v86_v20  ;;  %1114 = vmatpush1.msra.mxu1 %v88_v21  ;;  %v123_v54 = vld [vmem:[#allocation4 + $0x1a8] sm:$0xff]  ;;  %v125_v55 = vld [vmem:[#allocation4 + $0x1b8] sm:$0xff]  ;;  %v122_v56 = vld [vmem:[#allocation4 + $0x1a0] sm:$0xff] }
  0x5b   :  { %1106 = vmatprep.mubr.f32.mxu0 %v3541_v0  ;;  %1177 = vmatprep.mubr.f32.mxu1 %v3541_v0  ;;  %v124_v57 = vld [vmem:[#allocation4 + $0x1b0] sm:$0xff]  ;;  %v127_v58 = vld [vmem:[#allocation4 + $0x1c8] sm:$0xff]  ;;  %v129_v59 = vld [vmem:[#allocation4 + $0x1d8] sm:$0xff] }
  0x5c   :  { %3389 = vmatmul.mubr.msk.f32.vlgmr.msra.gmra.mrb[8].mxu0 %vm470_vm0, %v3630_v5  ;;  %3390 = vmatmul.mubr.msk.f32.vlgmr.msra.gmra.mrb[8].mxu1 %vm470_vm0, %v3630_v5  ;;  %v126_v60 = vld [vmem:[#allocation4 + $0x1c0] sm:$0xff]  ;;  %v128_v61 = vld [vmem:[#allocation4 + $0x1d0] sm:$0xff]  ;;  %v131_v62 = vld [vmem:[#allocation4 + $0x1e8] sm:$0xff] }
  0x5d   :  { %1184 = vmatprep.subr.mxu0 %v91_v22  ;;  %1255 = vmatprep.subr.mxu1 %v93_v23  ;;  %v133_v63 = vld [vmem:[#allocation4 + $0x1f8] sm:$0xff]  ;;  %v130_v1 = vld [vmem:[#allocation4 + $0x1e0] sm:$0xff]  ;;  %v132_v2 = vld [vmem:[#allocation4 + $0x1f0] sm:$0xff] }
  0x5e   :  { %1185 = vmatpush1.msra.mxu0 %v90_v24  ;;  %1256 = vmatpush1.msra.mxu1 %v92_v25  ;;  %v3740_v9 = vld [vmem:[#allocation6] sm:$0xff]  ;;  %v3761_v15 = vld [vmem:[%s4473_s4] sm:$0xf]  ;;  %v3779_v24 = vld [vmem:[#allocation6 + $0x8] sm:$0xff] }
  0x5f   :  { %1248 = vmatprep.mubr.f32.mxu0 %v3541_v0  ;;  %1319 = vmatprep.mubr.f32.mxu1 %v3541_v0  ;;  %v3748_v11 = vld [vmem:[#allocation7] ss:$8 sm:$0xf]  ;;  %v153_v14 = vrot.slane %v3740_v9, %v3729_v6  ;;  %v161_v16 = vrot.slane %v3740_v9, %v3732_v7  ;;  %v157_v17 = vrot.slane %v3740_v9, %v3735_v8  ;;  %v3775_v22 = vld [vmem:[#allocation7 + $0x1] ss:$8 sm:$0xf] }
  0x60   :  { %3391 = vmatmul.mubr.msk.f32.vlgmr.msra.gmra.mrb[10].mxu0 %vm470_vm0, %v3630_v5  ;;  %3392 = vmatmul.mubr.msk.f32.vlgmr.msra.gmra.mrb[10].mxu1 %vm470_vm0, %v3630_v5  ;;  %v2815_v19 = vrot.slane %v3748_v11, %v3729_v6  ;;  %v2823_v20 = vrot.slane %v3748_v11, %v3732_v7  ;;  %v169_v21 = vrot.slane %v3740_v9, %v3743_v10  ;;  %v3893_v3 = vld [vmem:[#allocation6 + $0x20] sm:$0xff] }
  0x61   :  { %1326 = vmatprep.subr.mxu0 %v95_v26  ;;  %1397 = vmatprep.subr.mxu1 %v97_v27  ;;  %v2819_v25 = vrot.slane %v3748_v11, %v3735_v8  ;;  %v173_v27 = vrot.slane %v3740_v9, %v3751_v12 }
  0x62   :  { %1327 = vmatpush1.msra.mxu0 %v94_v28  ;;  %1398 = vmatpush1.msra.mxu1 %v96_v29  ;;  %v181_v28 = vrot.slane %v3740_v9, %v3754_v13  ;;  %v2841_v29 = vrot.slane %v3761_v15, %v3729_v6 }
  0x63   :  { %1390 = vmatprep.mubr.f32.mxu0 %v3541_v0  ;;  %1461 = vmatprep.mubr.f32.mxu1 %v3541_v0 }
  0x64   :  { %3393 = vmatmul.mubr.msk.f32.vlgmr.msra.gmra.mrb[12].mxu0 %vm470_vm0, %v3630_v5  ;;  %3394 = vmatmul.mubr.msk.f32.vlgmr.msra.gmra.mrb[12].mxu1 %vm470_vm0, %v3630_v5 }
  0x65   :  { %1468 = vmatprep.subr.mxu0 %v99_v30  ;;  %1539 = vmatprep.subr.mxu1 %v101_v31  ;;  %v2849_v30 = vrot.slane %v3761_v15, %v3732_v7  ;;  %v2845_v31 = vrot.slane %v3761_v15, %v3735_v8 }
  0x66   :  { %1469 = vmatpush1.msra.mxu0 %v98_v32  ;;  %1540 = vmatpush1.msra.mxu1 %v100_v33  ;;  %v3797_v33 = vld [vmem:[#allocation7 + $0x2] ss:$8 sm:$0xf] }
  0x67   :  { %1532 = vmatprep.mubr.f32.mxu0 %v3541_v0  ;;  %1603 = vmatprep.mubr.f32.mxu1 %v3541_v0 }
  0x68   :  { %3395 = vmatmul.mubr.msk.f32.vlgmr.msra.gmra.mrb[14].mxu0 %vm470_vm0, %v3630_v5  ;;  %3396 = vmatmul.mubr.msk.f32.vlgmr.msra.gmra.mrb[14].mxu1 %vm470_vm0, %v3630_v5 }
  0x69   :  { %1610 = vmatprep.subr.mxu0 %v103_v34  ;;  %1681 = vmatprep.subr.mxu1 %v105_v35  ;;  %v2868_v34 = vrot.slane %v3775_v22, %v3729_v6  ;;  %v2876_v35 = vrot.slane %v3775_v22, %v3732_v7 }
  0x6a   :  { %1611 = vmatpush1.msra.mxu0 %v102_v36  ;;  %1682 = vmatpush1.msra.mxu1 %v104_v37 }
  0x6b   :  { %1674 = vmatprep.mubr.f32.mxu0 %v3541_v0  ;;  %1745 = vmatprep.mubr.f32.mxu1 %v3541_v0 }
  0x6c   :  { %3397 = vmatmul.mubr.msk.f32.vlgmr.msra.gmra.mrb[16].mxu0 %vm470_vm0, %v3630_v5  ;;  %3398 = vmatmul.mubr.msk.f32.vlgmr.msra.gmra.mrb[16].mxu1 %vm470_vm0, %v3630_v5 }
  0x6d   :  { %1752 = vmatprep.subr.mxu0 %v107_v38  ;;  %1823 = vmatprep.subr.mxu1 %v109_v39 }
  0x6e   :  { %1753 = vmatpush1.msra.mxu0 %v106_v40  ;;  %1824 = vmatpush1.msra.mxu1 %v108_v41  ;;  %v4049_v40 = vld [vmem:[#allocation7 + $0x27] ss:$8 sm:$0xf] }
  0x6f   :  { %1816 = vmatprep.mubr.f32.mxu0 %v3541_v0  ;;  %1887 = vmatprep.mubr.f32.mxu1 %v3541_v0 }
  0x70   :  { %3399 = vmatmul.mubr.msk.f32.vlgmr.msra.gmra.mrb[18].mxu0 %vm470_vm0, %v3630_v5  ;;  %3400 = vmatmul.mubr.msk.f32.vlgmr.msra.gmra.mrb[18].mxu1 %vm470_vm0, %v3630_v5 }
  0x71   :  { %1894 = vmatprep.subr.mxu0 %v111_v42  ;;  %1965 = vmatprep.subr.mxu1 %v113_v43  ;;  %v3815_v42 = vld [vmem:[#allocation7 + $0x3] ss:$8 sm:$0xf] }
  0x72   :  { %1895 = vmatpush1.msra.mxu0 %v110_v44  ;;  %1966 = vmatpush1.msra.mxu1 %v112_v45  ;;  %v3817_v43 = vld [vmem:[#allocation6 + $0x10] sm:$0xff] }
  0x73   :  { %1958 = vmatprep.mubr.f32.mxu0 %v3541_v0  ;;  %2029 = vmatprep.mubr.f32.mxu1 %v3541_v0  ;;  %v4025_v44 = vld [vmem:[#allocation7 + $0x26] ss:$8 sm:$0xf] }
  0x74   :  { %3401 = vmatmul.mubr.msk.f32.vlgmr.msra.gmra.mrb[20].mxu0 %vm470_vm0, %v3630_v5  ;;  %3402 = vmatmul.mubr.msk.f32.vlgmr.msra.gmra.mrb[20].mxu1 %vm470_vm0, %v3630_v5 }
  0x75   :  { %2036 = vmatprep.subr.mxu0 %v115_v46  ;;  %2107 = vmatprep.subr.mxu1 %v117_v47  ;;  %v3987_v47 = vld [vmem:[#allocation7 + $0x24] ss:$8 sm:$0xf]  ;;  %v4005_v46 = vld [vmem:[#allocation7 + $0x25] ss:$8 sm:$0xf] }
  0x76   :  { %2037 = vmatpush1.msra.mxu0 %v114_v48  ;;  %2108 = vmatpush1.msra.mxu1 %v116_v49  ;;  %v3967_v49 = vld [vmem:[#allocation7 + $0x23] ss:$8 sm:$0xf] }
  0x77   :  { %2100 = vmatprep.mubr.f32.mxu0 %v3541_v0  ;;  %2171 = vmatprep.mubr.f32.mxu1 %v3541_v0 }
  0x78   :  { %3403 = vmatmul.mubr.msk.f32.vlgmr.msra.gmra.mrb[22].mxu0 %vm470_vm0, %v3630_v5  ;;  %3404 = vmatmul.mubr.msk.f32.vlgmr.msra.gmra.mrb[22].mxu1 %vm470_vm0, %v3630_v5 }
  0x79   :  { %2178 = vmatprep.subr.mxu0 %v119_v50  ;;  %2249 = vmatprep.subr.mxu1 %v121_v51  ;;  %v3949_v50 = vld [vmem:[#allocation7 + $0x22] ss:$8 sm:$0xf]  ;;  %v3302_v51 = vrot.slane %v4049_v40, %v3729_v6 }
  0x7a   :  { %2179 = vmatpush1.msra.mxu0 %v118_v52  ;;  %2250 = vmatpush1.msra.mxu1 %v120_v53  ;;  %v3835_v52 = vld [vmem:[#allocation7 + $0x4] ss:$8 sm:$0xf]  ;;  %v3929_v53 = vld [vmem:[#allocation7 + $0x21] ss:$8 sm:$0xf] }
  0x7b   :  { %2242 = vmatprep.mubr.f32.mxu0 %v3541_v0  ;;  %2313 = vmatprep.mubr.f32.mxu1 %v3541_v0 }
  0x7c   :  { %3405 = vmatmul.mubr.msk.f32.vlgmr.msra.gmra.mrb[24].mxu0 %vm470_vm0, %v3630_v5  ;;  %3406 = vmatmul.mubr.msk.f32.vlgmr.msra.gmra.mrb[24].mxu1 %vm470_vm0, %v3630_v5 }
  0x7d   :  { %2320 = vmatprep.subr.mxu0 %v123_v54  ;;  %2391 = vmatprep.subr.mxu1 %v125_v55  ;;  %v3911_v54 = vld [vmem:[#allocation7 + $0x20] ss:$8 sm:$0xf] }
  0x7e   :  { %2321 = vmatpush1.msra.mxu0 %v122_v56  ;;  %2392 = vmatpush1.msra.mxu1 %v124_v57  ;;  %v3873_v57 = vld [vmem:[#allocation7 + $0x6] ss:$8 sm:$0xf]  ;;  %v3891_v56 = vld [vmem:[#allocation7 + $0x7] ss:$8 sm:$0xf] }
  0x7f   :  { %2384 = vmatprep.mubr.f32.mxu0 %v3541_v0  ;;  %2455 = vmatprep.mubr.f32.mxu1 %v3541_v0 }
  0x80   :  { %3407 = vmatmul.mubr.msk.f32.vlgmr.msra.gmra.mrb[26].mxu0 %vm470_vm0, %v3630_v5  ;;  %3408 = vmatmul.mubr.msk.f32.vlgmr.msra.gmra.mrb[26].mxu1 %vm470_vm0, %v3630_v5 }
  0x81   :  { %2462 = vmatprep.subr.mxu0 %v127_v58  ;;  %2533 = vmatprep.subr.mxu1 %v129_v59  ;;  %v3969_v59 = vld [vmem:[#allocation6 + $0x30] sm:$0xff] }
  0x82   :  { %2463 = vmatpush1.msra.mxu0 %v126_v60  ;;  %2534 = vmatpush1.msra.mxu1 %v128_v61  ;;  %v3853_v61 = vld [vmem:[#allocation7 + $0x5] ss:$8 sm:$0xf] }
  0x83   :  { %2526 = vmatprep.mubr.f32.mxu0 %v3541_v0  ;;  %2597 = vmatprep.mubr.f32.mxu1 %v3541_v0 }
  0x84   :  { %3409 = vmatmul.mubr.msk.f32.vlgmr.msra.gmra.mrb[28].mxu0 %vm470_vm0, %v3630_v5  ;;  %3410 = vmatmul.mubr.msk.f32.vlgmr.msra.gmra.mrb[28].mxu1 %vm470_vm0, %v3630_v5 }
  0x85   :  { %2604 = vmatprep.subr.mxu0 %v131_v62  ;;  %2675 = vmatprep.subr.mxu1 %v133_v63  ;;  %v3855_v62 = vld [vmem:[#allocation6 + $0x18] sm:$0xff]  ;;  %v3931_v63 = vld [vmem:[#allocation6 + $0x28] sm:$0xff] }
  0x86   :  { %2605 = vmatpush1.msra.mxu0 %v130_v1  ;;  %2676 = vmatpush1.msra.mxu1 %v132_v2  ;;  %v4007_v1 = vld [vmem:[#allocation6 + $0x38] sm:$0xff] }
  0x87   :  { %2668 = vmatprep.mubr.f32.mxu0 %v3541_v0  ;;  %2739 = vmatprep.mubr.f32.mxu1 %v3541_v0  ;;  %v3738_v0 = vsub.s32 3, %v3726_v4 }
  0x88   :  { %3411 = vmatmul.mubr.msk.f32.vlgmr.msra.gmra.mrb[30].mxu0 %vm470_vm0, %v3630_v5  ;;  %3412 = vmatmul.mubr.msk.f32.vlgmr.msra.gmra.mrb[30].mxu1 %vm470_vm0, %v3630_v5  ;;  %v3746_v5 = vsub.s32 6, %v3726_v4 }
  0x89   :  { %v165_v18 = vrot.slane %v3740_v9, %v3738_v0  ;;  %v2827_v26 = vrot.slane %v3748_v11, %v3738_v0  ;;  %v2853_v32 = vrot.slane %v3761_v15, %v3738_v0  ;;  %v4476_v15 = vrot.slane %v3779_v24, %v3732_v7 }
  0x8a   :  { %v177_v23 = vrot.slane %v3740_v9, %v3746_v5 }
 0x11f   :  { %v540_v41 = vpop.f32.mrb[0].mxu0  ;;  %v611_v60 = vpop.f32.mrb[0].mxu1 }
 0x120   :  { %v541_v48 = vadd.f32 %v540_v41, %v153_v14  ;;  %v612_v55 = vadd.f32 %v611_v60, %v161_v16  ;;  %v542_v58 = vpop.f32.mrb[1].mxu0  ;;  %v613_v39 = vpop.f32.mrb[1].mxu1  ;;  %v397_v41 = vrot.slane %v4007_v1, %v3751_v12  ;;  %v405_v16 = vrot.slane %v4007_v1, %v3754_v13 }
 0x121   :  { %v543_v2 = vadd.f32 %v542_v58, %v157_v17  ;;  %v614_v14 = vadd.f32 %v613_v39, %v165_v18 }
 0x122   :  { %v2746_v60 = vmax.f32 %v541_v48, 0.0  ;;  %v2748_v38 = vmax.f32 %v612_v55, 0.0 }
 0x123   :  { %v2747_v37 = vmax.f32 %v543_v2, 0.0  ;;  %v2749_v17 = vmax.f32 %v614_v14, 0.0  ;;  %v682_v58 = vpop.f32.mrb[2].mxu0  ;;  %v753_v36 = vpop.f32.mrb[2].mxu1 }
 0x124   :  { %v2832_v48 = vmul.f32 %v2815_v19, %v2746_v60  ;;  %v2834_v55 = vmul.f32 %v2823_v20, %v2748_v38  ;;  %v683_v2 = vadd.f32 %v682_v58, %v169_v21  ;;  %v754_v14 = vadd.f32 %v753_v36, %v177_v23  ;;  %v684_v18 = vpop.f32.mrb[3].mxu0  ;;  %v755_v45 = vpop.f32.mrb[3].mxu1 }
 0x125   :  { %v2833_v39 = vmul.f32 %v2819_v25, %v2747_v37  ;;  %v2835_v19 = vmul.f32 %v2827_v26, %v2749_v17  ;;  %v685_v20 = vadd.f32 %v684_v18, %v173_v27  ;;  %v756_v21 = vadd.f32 %v755_v45, %v181_v28 }
 0x126   :  { %v2858_v23 = vadd.f32 %v2841_v29, %v2832_v48  ;;  %v2860_v25 = vadd.f32 %v2849_v30, %v2834_v55  ;;  %v2750_v36 = vmax.f32 %v683_v2, 0.0  ;;  %v2752_v37 = vmax.f32 %v754_v14, 0.0 }
 0x127   :  { %v2859_v11 = vadd.f32 %v2845_v31, %v2833_v39  ;;  %v2861_v26 = vadd.f32 %v2853_v32, %v2835_v19  ;;  %v2751_v9 = vmax.f32 %v685_v20, 0.0  ;;  %v2753_v27 = vmax.f32 %v756_v21, 0.0  ;;  %v824_v28 = vpop.f32.mrb[4].mxu0  ;;  %v895_v38 = vpop.f32.mrb[4].mxu1 }
 0x128   :  { %v2885_v29 = vmul.f32 %v2868_v34, %v2750_v36  ;;  %v2887_v30 = vmul.f32 %v2876_v35, %v2752_v37  ;;  %v4475_v45 = vrot.slane %v3779_v24, %v3729_v6  ;;  %v896_v32 = vadd.f32 %v895_v38, %v4476_v15  ;;  %v826_v60 = vpop.f32.mrb[5].mxu0  ;;  %v897_v17 = vpop.f32.mrb[5].mxu1 }
 0x129   :  { %v4477_v58 = vrot.slane %v3775_v22, %v3735_v8  ;;  %v4478_v34 = vrot.slane %v3775_v22, %v3738_v0  ;;  %v4479_v35 = vrot.slane %v3779_v24, %v3735_v8  ;;  %v4480_v55 = vrot.slane %v3779_v24, %v3738_v0 }
 0x12a   :  { %v825_v31 = vadd.f32 %v824_v28, %v4475_v45  ;;  %v2889_v14 = vadd.f32 %v2885_v29, %v2858_v23  ;;  %v2891_v19 = vadd.f32 %v2887_v30, %v2860_v25  ;;  %v2756_v21 = vmax.f32 %v896_v32, 0.0 }
 0x12b   :  { %v2886_v18 = vmul.f32 %v4477_v58, %v2751_v9  ;;  %v2888_v39 = vmul.f32 %v4478_v34, %v2753_v27  ;;  %v827_v48 = vadd.f32 %v826_v60, %v4479_v35  ;;  %v898_v2 = vadd.f32 %v897_v17, %v4480_v55  ;;  %v966_v38 = vpop.f32.mrb[6].mxu0  ;;  %v1037_v45 = vpop.f32.mrb[6].mxu1 }
 0x12c   :  { %v2754_v20 = vmax.f32 %v825_v31, 0.0  ;;  %v4481_v22 = vrot.slane %v3797_v33, %v3729_v6  ;;  %v4482_v15 = vrot.slane %v3797_v33, %v3732_v7  ;;  %v4483_v23 = vrot.slane %v3779_v24, %v3743_v10  ;;  %v968_v29 = vpop.f32.mrb[7].mxu0  ;;  %v1039_v30 = vpop.f32.mrb[7].mxu1 }
 0x12d   :  { %v2890_v36 = vadd.f32 %v2886_v18, %v2859_v11  ;;  %v2892_v37 = vadd.f32 %v2888_v39, %v2861_v26  ;;  %v2755_v28 = vmax.f32 %v827_v48, 0.0  ;;  %v2757_v9 = vmax.f32 %v898_v2, 0.0 }
 0x12e   :  { %v2916_v27 = vmul.f32 %v4481_v22, %v2754_v20  ;;  %v2918_v60 = vmul.f32 %v4482_v15, %v2756_v21  ;;  %v967_v25 = vadd.f32 %v966_v38, %v4483_v23  ;;  %v4484_v11 = vrot.slane %v3779_v24, %v3746_v5 }
 0x12f   :  { %v4485_v31 = vrot.slane %v3797_v33, %v3735_v8  ;;  %v4486_v17 = vrot.slane %v3797_v33, %v3738_v0  ;;  %v4487_v18 = vrot.slane %v3779_v24, %v3751_v12  ;;  %v4488_v39 = vrot.slane %v3779_v24, %v3754_v13  ;;  %v1108_v22 = vpop.f32.mrb[8].mxu0  ;;  %v1179_v15 = vpop.f32.mrb[8].mxu1 }
 0x130   :  { %v1038_v26 = vadd.f32 %v1037_v45, %v4484_v11  ;;  %v2920_v48 = vadd.f32 %v2916_v27, %v2889_v14  ;;  %v2922_v55 = vadd.f32 %v2918_v60, %v2891_v19  ;;  %v2758_v2 = vmax.f32 %v967_v25, 0.0  ;;  %v1181_v27 = vpop.f32.mrb[9].mxu1 }
 0x131   :  { %v2917_v32 = vmul.f32 %v4485_v31, %v2755_v28  ;;  %v2919_v58 = vmul.f32 %v4486_v17, %v2757_v9  ;;  %v969_v34 = vadd.f32 %v968_v29, %v4487_v18  ;;  %v1040_v35 = vadd.f32 %v1039_v30, %v4488_v39 }
 0x132   :  { %v2760_v20 = vmax.f32 %v1038_v26, 0.0  ;;  %v4489_v33 = vrot.slane %v3815_v42, %v3729_v6  ;;  %v4490_v23 = vrot.slane %v3815_v42, %v3732_v7  ;;  %v4491_v24 = vrot.slane %v3817_v43, %v3729_v6 }
 0x133   :  { %v2921_v21 = vadd.f32 %v2917_v32, %v2890_v36  ;;  %v2923_v38 = vadd.f32 %v2919_v58, %v2892_v37  ;;  %v2759_v45 = vmax.f32 %v969_v34, 0.0  ;;  %v2761_v28 = vmax.f32 %v1040_v35, 0.0  ;;  %v1110_v37 = vpop.f32.mrb[9].mxu0 }
 0x134   :  { %v2947_v9 = vmul.f32 %v4489_v33, %v2758_v2  ;;  %v2949_v11 = vmul.f32 %v4490_v23, %v2760_v20  ;;  %v1109_v14 = vadd.f32 %v1108_v22, %v4491_v24  ;;  %v4492_v19 = vrot.slane %v3817_v43, %v3732_v7  ;;  %v1250_v22 = vpop.f32.mrb[10].mxu0 }
 0x135   :  { %v4493_v60 = vrot.slane %v3815_v42, %v3735_v8  ;;  %v4494_v26 = vrot.slane %v3815_v42, %v3738_v0  ;;  %v4495_v30 = vrot.slane %v3817_v43, %v3735_v8  ;;  %v4496_v32 = vrot.slane %v3817_v43, %v3738_v0 }
 0x136   :  { %v1180_v36 = vadd.f32 %v1179_v15, %v4492_v19  ;;  %v2951_v58 = vadd.f32 %v2947_v9, %v2920_v48  ;;  %v2953_v18 = vadd.f32 %v2949_v11, %v2922_v55  ;;  %v2762_v34 = vmax.f32 %v1109_v14, 0.0  ;;  %v1321_v15 = vpop.f32.mrb[10].mxu1  ;;  %v1252_v9 = vpop.f32.mrb[11].mxu0 }
 0x137   :  { %v2948_v25 = vmul.f32 %v4493_v60, %v2759_v45  ;;  %v2950_v29 = vmul.f32 %v4494_v26, %v2761_v28  ;;  %v1111_v31 = vadd.f32 %v1110_v37, %v4495_v30  ;;  %v1182_v17 = vadd.f32 %v1181_v27, %v4496_v32  ;;  %v1323_v11 = vpop.f32.mrb[11].mxu1 }
 0x138   :  { %v2764_v39 = vmax.f32 %v1180_v36, 0.0  ;;  %v4497_v42 = vrot.slane %v3835_v52, %v3729_v6  ;;  %v4498_v33 = vrot.slane %v3835_v52, %v3732_v7  ;;  %v4499_v48 = vrot.slane %v3817_v43, %v3743_v10 }
 0x139   :  { %v2952_v35 = vadd.f32 %v2948_v25, %v2921_v21  ;;  %v2954_v2 = vadd.f32 %v2950_v29, %v2923_v38  ;;  %v2763_v20 = vmax.f32 %v1111_v31, 0.0  ;;  %v2765_v45 = vmax.f32 %v1182_v17, 0.0 }
 0x13a   :  { %v2978_v28 = vmul.f32 %v4497_v42, %v2762_v34  ;;  %v2980_v23 = vmul.f32 %v4498_v33, %v2764_v39  ;;  %v1251_v55 = vadd.f32 %v1250_v22, %v4499_v48  ;;  %v4500_v21 = vrot.slane %v3817_v43, %v3746_v5  ;;  %v1463_v22 = vpop.f32.mrb[12].mxu1 }
 0x13b   :  { %v4501_v24 = vrot.slane %v3835_v52, %v3735_v8  ;;  %v4502_v19 = vrot.slane %v3835_v52, %v3738_v0  ;;  %v4503_v37 = vrot.slane %v3817_v43, %v3751_v12  ;;  %v4504_v60 = vrot.slane %v3817_v43, %v3754_v13 }
 0x13c   :  { %v1322_v38 = vadd.f32 %v1321_v15, %v4500_v21  ;;  %v2982_v26 = vadd.f32 %v2978_v28, %v2951_v58  ;;  %v2984_v29 = vadd.f32 %v2980_v23, %v2953_v18  ;;  %v2766_v30 = vmax.f32 %v1251_v55, 0.0  ;;  %v1465_v28 = vpop.f32.mrb[13].mxu1 }
 0x13d   :  { %v2979_v14 = vmul.f32 %v4501_v24, %v2763_v20  ;;  %v2981_v36 = vmul.f32 %v4502_v19, %v2765_v45  ;;  %v1253_v27 = vadd.f32 %v1252_v9, %v4503_v37  ;;  %v1324_v25 = vadd.f32 %v1323_v11, %v4504_v60  ;;  %v1392_v20 = vpop.f32.mrb[12].mxu0 }
 0x13e   :  { %v2768_v31 = vmax.f32 %v1322_v38, 0.0  ;;  %v4505_v52 = vrot.slane %v3853_v61, %v3729_v6  ;;  %v4506_v15 = vrot.slane %v3853_v61, %v3732_v7  ;;  %v4507_v43 = vrot.slane %v3855_v62, %v3729_v6 }
 0x13f   :  { %v2983_v32 = vadd.f32 %v2979_v14, %v2952_v35  ;;  %v2985_v17 = vadd.f32 %v2981_v36, %v2954_v2  ;;  %v2767_v34 = vmax.f32 %v1253_v27, 0.0  ;;  %v2769_v39 = vmax.f32 %v1324_v25, 0.0  ;;  %v1394_v2 = vpop.f32.mrb[13].mxu0 }
 0x140   :  { %v3009_v45 = vmul.f32 %v4505_v52, %v2766_v30  ;;  %v3011_v42 = vmul.f32 %v4506_v15, %v2768_v31  ;;  %v1393_v58 = vadd.f32 %v1392_v20, %v4507_v43  ;;  %v4508_v18 = vrot.slane %v3855_v62, %v3732_v7  ;;  %v1534_v30 = vpop.f32.mrb[14].mxu0  ;;  %v1605_v31 = vpop.f32.mrb[14].mxu1 }
 0x141   :  { %v4509_v33 = vrot.slane %v3853_v61, %v3735_v8  ;;  %v4510_v48 = vrot.slane %v3853_v61, %v3738_v0  ;;  %v4511_v21 = vrot.slane %v3855_v62, %v3735_v8  ;;  %v4512_v9 = vrot.slane %v3855_v62, %v3738_v0  ;;  %v1607_v52 = vpop.f32.mrb[15].mxu1 }
 0x142   :  { %v1464_v35 = vadd.f32 %v1463_v22, %v4508_v18  ;;  %v3013_v24 = vadd.f32 %v3009_v45, %v2982_v26  ;;  %v3015_v14 = vadd.f32 %v3011_v42, %v2984_v29  ;;  %v2770_v19 = vmax.f32 %v1393_v58, 0.0  ;;  %v1536_v22 = vpop.f32.mrb[15].mxu0 }
 0x143   :  { %v3010_v23 = vmul.f32 %v4509_v33, %v2767_v34  ;;  %v3012_v55 = vmul.f32 %v4510_v48, %v2769_v39  ;;  %v1395_v38 = vadd.f32 %v1394_v2, %v4511_v21  ;;  %v1466_v11 = vadd.f32 %v1465_v28, %v4512_v9 }
 0x144   :  { %v2772_v36 = vmax.f32 %v1464_v35, 0.0  ;;  %v4513_v61 = vrot.slane %v3873_v57, %v3729_v6  ;;  %v4514_v39 = vrot.slane %v3873_v57, %v3732_v7  ;;  %v4515_v26 = vrot.slane %v3855_v62, %v3743_v10 }
 0x145   :  { %v3014_v37 = vadd.f32 %v3010_v23, %v2983_v32  ;;  %v3016_v27 = vadd.f32 %v3012_v55, %v2985_v17  ;;  %v2771_v60 = vmax.f32 %v1395_v38, 0.0  ;;  %v2773_v25 = vmax.f32 %v1466_v11, 0.0  ;;  %v1676_v11 = vpop.f32.mrb[16].mxu0 }
 0x146   :  { %v3040_v34 = vmul.f32 %v4513_v61, %v2770_v19  ;;  %v3042_v20 = vmul.f32 %v4514_v39, %v2772_v36  ;;  %v1535_v29 = vadd.f32 %v1534_v30, %v4515_v26  ;;  %v4516_v32 = vrot.slane %v3855_v62, %v3746_v5  ;;  %v1747_v19 = vpop.f32.mrb[16].mxu1 }
 0x147   :  { %v4517_v45 = vrot.slane %v3873_v57, %v3735_v8  ;;  %v4518_v42 = vrot.slane %v3873_v57, %v3738_v0  ;;  %v4519_v58 = vrot.slane %v3855_v62, %v3751_v12  ;;  %v4520_v35 = vrot.slane %v3855_v62, %v3754_v13  ;;  %v1749_v30 = vpop.f32.mrb[17].mxu1 }
 0x148   :  { %v1606_v17 = vadd.f32 %v1605_v31, %v4516_v32  ;;  %v3044_v28 = vadd.f32 %v3040_v34, %v3013_v24  ;;  %v3046_v33 = vadd.f32 %v3042_v20, %v3015_v14  ;;  %v2774_v23 = vmax.f32 %v1535_v29, 0.0 }
 0x149   :  { %v3041_v15 = vmul.f32 %v4517_v45, %v2771_v60  ;;  %v3043_v43 = vmul.f32 %v4518_v42, %v2773_v25  ;;  %v1537_v18 = vadd.f32 %v1536_v22, %v4519_v58  ;;  %v1608_v2 = vadd.f32 %v1607_v52, %v4520_v35  ;;  %v1889_v35 = vpop.f32.mrb[18].mxu1 }
 0x14a   :  { %v2776_v48 = vmax.f32 %v1606_v17, 0.0  ;;  %v4521_v57 = vrot.slane %v3891_v56, %v3729_v6  ;;  %v4522_v60 = vrot.slane %v3891_v56, %v3732_v7  ;;  %v4523_v62 = vrot.slane %v3893_v3, %v3729_v6 }
 0x14b   :  { %v3045_v55 = vadd.f32 %v3041_v15, %v3014_v37  ;;  %v3047_v21 = vadd.f32 %v3043_v43, %v3016_v27  ;;  %v2775_v38 = vmax.f32 %v1537_v18, 0.0  ;;  %v2777_v9 = vmax.f32 %v1608_v2, 0.0  ;;  %v1678_v27 = vpop.f32.mrb[17].mxu0 }
 0x14c   :  { %v3071_v36 = vmul.f32 %v4521_v57, %v2774_v23  ;;  %v3073_v25 = vmul.f32 %v4522_v60, %v2776_v48  ;;  %v1677_v24 = vadd.f32 %v1676_v11, %v4523_v62  ;;  %v4524_v14 = vrot.slane %v3893_v3, %v3732_v7  ;;  %v1818_v18 = vpop.f32.mrb[18].mxu0 }
 0x14d   :  { %v4525_v31 = vrot.slane %v3891_v56, %v3735_v8  ;;  %v4526_v34 = vrot.slane %v3891_v56, %v3738_v0  ;;  %v4527_v20 = vrot.slane %v3893_v3, %v3735_v8  ;;  %v4528_v29 = vrot.slane %v3893_v3, %v3738_v0 }
 0x14e   :  { %v1748_v37 = vadd.f32 %v1747_v19, %v4524_v14  ;;  %v3075_v17 = vadd.f32 %v3071_v36, %v3044_v28  ;;  %v3077_v22 = vadd.f32 %v3073_v25, %v3046_v33  ;;  %v2778_v52 = vmax.f32 %v1677_v24, 0.0 }
 0x14f   :  { %v3072_v61 = vmul.f32 %v4525_v31, %v2775_v38  ;;  %v3074_v39 = vmul.f32 %v4526_v34, %v2777_v9  ;;  %v1679_v26 = vadd.f32 %v1678_v27, %v4527_v20  ;;  %v1750_v32 = vadd.f32 %v1749_v30, %v4528_v29  ;;  %v1820_v38 = vpop.f32.mrb[19].mxu0  ;;  %v1891_v9 = vpop.f32.mrb[19].mxu1 }
 0x150   :  { %v2780_v45 = vmax.f32 %v1748_v37, 0.0  ;;  %v4529_v56 = vrot.slane %v3911_v54, %v3729_v6  ;;  %v4530_v23 = vrot.slane %v3911_v54, %v3732_v7  ;;  %v4531_v28 = vrot.slane %v3893_v3, %v3743_v10  ;;  %v1960_v20 = vpop.f32.mrb[20].mxu0 }
 0x151   :  { %v3076_v15 = vadd.f32 %v3072_v61, %v3045_v55  ;;  %v3078_v42 = vadd.f32 %v3074_v39, %v3047_v21  ;;  %v2779_v43 = vmax.f32 %v1679_v26, 0.0  ;;  %v2781_v58 = vmax.f32 %v1750_v32, 0.0  ;;  %v2031_v26 = vpop.f32.mrb[20].mxu1 }
 0x152   :  { %v3102_v2 = vmul.f32 %v4529_v56, %v2778_v52  ;;  %v3104_v48 = vmul.f32 %v4530_v23, %v2780_v45  ;;  %v1819_v33 = vadd.f32 %v1818_v18, %v4531_v28  ;;  %v4532_v55 = vrot.slane %v3893_v3, %v3746_v5 }
 0x153   :  { %v4533_v11 = vrot.slane %v3911_v54, %v3735_v8  ;;  %v4534_v57 = vrot.slane %v3911_v54, %v3738_v0  ;;  %v4535_v60 = vrot.slane %v3893_v3, %v3751_v12  ;;  %v4536_v62 = vrot.slane %v3893_v3, %v3754_v13 }
 0x154   :  { %v1890_v21 = vadd.f32 %v1889_v35, %v4532_v55  ;;  %v3106_v14 = vadd.f32 %v3102_v2, %v3075_v17  ;;  %v3108_v37 = vadd.f32 %v3104_v48, %v3077_v22  ;;  %v2782_v27 = vmax.f32 %v1819_v33, 0.0 }
 0x155   :  { %v3103_v19 = vmul.f32 %v4533_v11, %v2779_v43  ;;  %v3105_v36 = vmul.f32 %v4534_v57, %v2781_v58  ;;  %v1821_v25 = vadd.f32 %v1820_v38, %v4535_v60  ;;  %v1892_v24 = vadd.f32 %v1891_v9, %v4536_v62 }
 0x156   :  { %v2784_v30 = vmax.f32 %v1890_v21, 0.0  ;;  %v4537_v54 = vrot.slane %v3929_v53, %v3729_v6  ;;  %v4538_v32 = vrot.slane %v3929_v53, %v3732_v7  ;;  %v4539_v3 = vrot.slane %v3931_v63, %v3729_v6 }
 0x157   :  { %v3107_v31 = vadd.f32 %v3103_v19, %v3076_v15  ;;  %v3109_v61 = vadd.f32 %v3105_v36, %v3078_v42  ;;  %v2783_v34 = vmax.f32 %v1821_v25, 0.0  ;;  %v2785_v39 = vmax.f32 %v1892_v24, 0.0  ;;  %v1962_v15 = vpop.f32.mrb[21].mxu0  ;;  %v2033_v42 = vpop.f32.mrb[21].mxu1 }
 0x158   :  { %v3133_v29 = vmul.f32 %v4537_v54, %v2782_v27  ;;  %v3135_v52 = vmul.f32 %v4538_v32, %v2784_v30  ;;  %v1961_v17 = vadd.f32 %v1960_v20, %v4539_v3  ;;  %v4540_v22 = vrot.slane %v3931_v63, %v3732_v7  ;;  %v2102_v57 = vpop.f32.mrb[22].mxu0  ;;  %v2173_v36 = vpop.f32.mrb[22].mxu1 }
 0x159   :  { %v4541_v43 = vrot.slane %v3929_v53, %v3735_v8  ;;  %v4542_v18 = vrot.slane %v3929_v53, %v3738_v0  ;;  %v4543_v56 = vrot.slane %v3931_v63, %v3735_v8  ;;  %v4544_v23 = vrot.slane %v3931_v63, %v3738_v0  ;;  %v2104_v30 = vpop.f32.mrb[23].mxu0 }
 0x15a   :  { %v2032_v45 = vadd.f32 %v2031_v26, %v4540_v22  ;;  %v3137_v28 = vadd.f32 %v3133_v29, %v3106_v14  ;;  %v3139_v33 = vadd.f32 %v3135_v52, %v3108_v37  ;;  %v2786_v55 = vmax.f32 %v1961_v17, 0.0 }
 0x15b   :  { %v3134_v58 = vmul.f32 %v4541_v43, %v2783_v34  ;;  %v3136_v35 = vmul.f32 %v4542_v18, %v2785_v39  ;;  %v1963_v2 = vadd.f32 %v1962_v15, %v4543_v56  ;;  %v2034_v48 = vadd.f32 %v2033_v42, %v4544_v23 }
 0x15c   :  { %v2788_v21 = vmax.f32 %v2032_v45, 0.0  ;;  %v4545_v53 = vrot.slane %v3949_v50, %v3729_v6  ;;  %v4546_v25 = vrot.slane %v3949_v50, %v3732_v7  ;;  %v4547_v24 = vrot.slane %v3931_v63, %v3743_v10 }
 0x15d   :  { %v3138_v38 = vadd.f32 %v3134_v58, %v3107_v31  ;;  %v3140_v9 = vadd.f32 %v3136_v35, %v3109_v61  ;;  %v2787_v11 = vmax.f32 %v1963_v2, 0.0  ;;  %v2789_v19 = vmax.f32 %v2034_v48, 0.0  ;;  %v2175_v31 = vpop.f32.mrb[23].mxu1  ;;  %v2244_v58 = vpop.f32.mrb[24].mxu0 }
 0x15e   :  { %v3164_v60 = vmul.f32 %v4545_v53, %v2786_v55  ;;  %v3166_v62 = vmul.f32 %v4546_v25, %v2788_v21  ;;  %v2103_v14 = vadd.f32 %v2102_v57, %v4547_v24  ;;  %v4548_v37 = vrot.slane %v3931_v63, %v3746_v5  ;;  %v2315_v18 = vpop.f32.mrb[24].mxu1 }
 0x15f   :  { %v4549_v61 = vrot.slane %v3949_v50, %v3735_v8  ;;  %v4550_v39 = vrot.slane %v3949_v50, %v3738_v0  ;;  %v4551_v26 = vrot.slane %v3931_v63, %v3751_v12  ;;  %v4552_v29 = vrot.slane %v3931_v63, %v3754_v13  ;;  %v2317_v55 = vpop.f32.mrb[25].mxu1 }
 0x160   :  { %v2174_v27 = vadd.f32 %v2173_v36, %v4548_v37  ;;  %v3168_v52 = vadd.f32 %v3164_v60, %v3137_v28  ;;  %v3170_v3 = vadd.f32 %v3166_v62, %v3139_v33  ;;  %v2790_v17 = vmax.f32 %v2103_v14, 0.0  ;;  %v2246_v33 = vpop.f32.mrb[25].mxu0 }
 0x161   :  { %v3165_v34 = vmul.f32 %v4549_v61, %v2787_v11  ;;  %v3167_v20 = vmul.f32 %v4550_v39, %v2789_v19  ;;  %v2105_v54 = vadd.f32 %v2104_v30, %v4551_v26  ;;  %v2176_v32 = vadd.f32 %v2175_v31, %v4552_v29  ;;  %v2386_v31 = vpop.f32.mrb[26].mxu0  ;;  %v2457_v61 = vpop.f32.mrb[26].mxu1 }
 0x162   :  { %v2792_v22 = vmax.f32 %v2174_v27, 0.0  ;;  %v4553_v50 = vrot.slane %v3967_v49, %v3729_v6  ;;  %v4554_v56 = vrot.slane %v3967_v49, %v3732_v7  ;;  %v4555_v63 = vrot.slane %v3969_v59, %v3729_v6 }
 0x163   :  { %v3169_v45 = vadd.f32 %v3165_v34, %v3138_v38  ;;  %v3171_v15 = vadd.f32 %v3167_v20, %v3140_v9  ;;  %v2791_v42 = vmax.f32 %v2105_v54, 0.0  ;;  %v2793_v43 = vmax.f32 %v2176_v32, 0.0 }
 0x164   :  { %v3195_v35 = vmul.f32 %v4553_v50, %v2790_v17  ;;  %v3197_v2 = vmul.f32 %v4554_v56, %v2792_v22  ;;  %v2245_v23 = vadd.f32 %v2244_v58, %v4555_v63  ;;  %v4556_v48 = vrot.slane %v3969_v59, %v3732_v7 }
 0x165   :  { %v4557_v21 = vrot.slane %v3967_v49, %v3735_v8  ;;  %v4558_v9 = vrot.slane %v3967_v49, %v3738_v0  ;;  %v4559_v19 = vrot.slane %v3969_v59, %v3735_v8  ;;  %v4560_v36 = vrot.slane %v3969_v59, %v3738_v0 }
 0x166   :  { %v2316_v28 = vadd.f32 %v2315_v18, %v4556_v48  ;;  %v3199_v60 = vadd.f32 %v3195_v35, %v3168_v52  ;;  %v3201_v25 = vadd.f32 %v3197_v2, %v3170_v3  ;;  %v2794_v62 = vmax.f32 %v2245_v23, 0.0  ;;  %v2388_v52 = vpop.f32.mrb[27].mxu0  ;;  %v2459_v3 = vpop.f32.mrb[27].mxu1 }
 0x167   :  { %v3196_v38 = vmul.f32 %v4557_v21, %v2791_v42  ;;  %v3198_v11 = vmul.f32 %v4558_v9, %v2793_v43  ;;  %v2247_v57 = vadd.f32 %v2246_v33, %v4559_v19  ;;  %v2318_v53 = vadd.f32 %v2317_v55, %v4560_v36  ;;  %v2528_v33 = vpop.f32.mrb[28].mxu0  ;;  %v2599_v55 = vpop.f32.mrb[28].mxu1 }
 0x168   :  { %v2796_v24 = vmax.f32 %v2316_v28, 0.0  ;;  %v4561_v49 = vrot.slane %v3987_v47, %v3729_v6  ;;  %v4562_v39 = vrot.slane %v3987_v47, %v3732_v7  ;;  %v4563_v26 = vrot.slane %v3969_v59, %v3743_v10  ;;  %v2530_v36 = vpop.f32.mrb[29].mxu0 }
 0x169   :  { %v3200_v14 = vadd.f32 %v3196_v38, %v3169_v45  ;;  %v3202_v37 = vadd.f32 %v3198_v11, %v3171_v15  ;;  %v2795_v27 = vmax.f32 %v2247_v57, 0.0  ;;  %v2797_v30 = vmax.f32 %v2318_v53, 0.0  ;;  %v2601_v53 = vpop.f32.mrb[29].mxu1 }
 0x16a   :  { %v3226_v34 = vmul.f32 %v4561_v49, %v2794_v62  ;;  %v3228_v20 = vmul.f32 %v4562_v39, %v2796_v24  ;;  %v2387_v54 = vadd.f32 %v2386_v31, %v4563_v26  ;;  %v4564_v29 = vrot.slane %v3969_v59, %v3746_v5 }
 0x16b   :  { %v4565_v17 = vrot.slane %v3987_v47, %v3735_v8  ;;  %v4566_v45 = vrot.slane %v3987_v47, %v3738_v0  ;;  %v4567_v42 = vrot.slane %v3969_v59, %v3751_v12  ;;  %v4568_v58 = vrot.slane %v3969_v59, %v3754_v13 }
 0x16c   :  { %v2458_v32 = vadd.f32 %v2457_v61, %v4564_v29  ;;  %v3230_v50 = vadd.f32 %v3226_v34, %v3199_v60  ;;  %v3232_v35 = vadd.f32 %v3228_v20, %v3201_v25  ;;  %v2798_v56 = vmax.f32 %v2387_v54, 0.0  ;;  %v2670_v29 = vpop.f32.mrb[30].mxu0 }
 0x16d   :  { %v3227_v22 = vmul.f32 %v4565_v17, %v2795_v27  ;;  %v3229_v15 = vmul.f32 %v4566_v45, %v2797_v30  ;;  %v2389_v43 = vadd.f32 %v2388_v52, %v4567_v42  ;;  %v2460_v18 = vadd.f32 %v2459_v3, %v4568_v58 }
 0x16e   :  { %v2800_v2 = vmax.f32 %v2458_v32, 0.0  ;;  %v4569_v47 = vrot.slane %v4005_v46, %v3729_v6  ;;  %v4570_v38 = vrot.slane %v4005_v46, %v3732_v7  ;;  %v4571_v59 = vrot.slane %v4007_v1, %v3729_v6  ;;  %v2741_v32 = vpop.f32.mrb[30].mxu1 }
 0x16f   :  { %v3231_v63 = vadd.f32 %v3227_v22, %v3200_v14  ;;  %v3233_v23 = vadd.f32 %v3229_v15, %v3202_v37  ;;  %v2799_v48 = vmax.f32 %v2389_v43, 0.0  ;;  %v2801_v28 = vmax.f32 %v2460_v18, 0.0  ;;  %v2672_v43 = vpop.f32.mrb[31].mxu0  ;;  %v2743_v58 = vpop.f32.mrb[31].mxu1 }
 0x170   :  { %v3257_v21 = vmul.f32 %v4569_v47, %v2798_v56  ;;  %v3259_v9 = vmul.f32 %v4570_v38, %v2800_v2  ;;  %v2529_v11 = vadd.f32 %v2528_v33, %v4571_v59  ;;  %v4572_v19 = vrot.slane %v4007_v1, %v3732_v7 }
 0x171   :  { %v4573_v60 = vrot.slane %v4005_v46, %v3735_v8  ;;  %v4574_v62 = vrot.slane %v4005_v46, %v3738_v0  ;;  %v4575_v14 = vrot.slane %v4007_v1, %v3735_v8  ;;  %v4576_v27 = vrot.slane %v4007_v1, %v3738_v0 }
 0x172   :  { %v2600_v57 = vadd.f32 %v2599_v55, %v4572_v19  ;;  %v3261_v31 = vadd.f32 %v3257_v21, %v3230_v50  ;;  %v3263_v61 = vadd.f32 %v3259_v9, %v3232_v35  ;;  %v2802_v49 = vmax.f32 %v2529_v11, 0.0 }
 0x173   :  { %v3258_v25 = vmul.f32 %v4573_v60, %v2799_v48  ;;  %v3260_v24 = vmul.f32 %v4574_v62, %v2801_v28  ;;  %v2531_v37 = vadd.f32 %v2530_v36, %v4575_v14  ;;  %v2602_v30 = vadd.f32 %v2601_v53, %v4576_v27 }
 0x174   :  { %v2804_v34 = vmax.f32 %v2600_v57, 0.0  ;;  %v4577_v46 = vrot.slane %v4025_v44, %v3729_v6  ;;  %v4578_v3 = vrot.slane %v4025_v44, %v3732_v7  ;;  %v4579_v22 = vrot.slane %v4007_v1, %v3743_v10 }
 0x175   :  { %v3262_v39 = vadd.f32 %v3258_v25, %v3231_v63  ;;  %v3264_v20 = vadd.f32 %v3260_v24, %v3233_v23  ;;  %v2803_v26 = vmax.f32 %v2531_v37, 0.0  ;;  %v2805_v54 = vmax.f32 %v2602_v30, 0.0 }
 0x176   :  { %v3288_v52 = vmul.f32 %v4577_v46, %v2802_v49  ;;  %v3290_v17 = vmul.f32 %v4578_v3, %v2804_v34  ;;  %v2671_v45 = vadd.f32 %v2670_v29, %v4579_v22  ;;  %v4580_v15 = vrot.slane %v4007_v1, %v3746_v5 }
 0x177   :  { %v4581_v18 = vrot.slane %v4025_v44, %v3735_v8  ;;  %v4582_v35 = vrot.slane %v4025_v44, %v3738_v0  ;;  %v2673_v2 = vadd.f32 %v2672_v43, %v397_v41  ;;  %v2744_v10 = vadd.f32 %v2743_v58, %v405_v16 }
 0x178   :  { %v2742_v42 = vadd.f32 %v2741_v32, %v4580_v15  ;;  %v3292_v5 = vadd.f32 %v3288_v52, %v3261_v31  ;;  %v3294_v63 = vadd.f32 %v3290_v17, %v3263_v61  ;;  %v2806_v23 = vmax.f32 %v2671_v45, 0.0 }
 0x179   :  { %v3289_v50 = vmul.f32 %v4581_v18, %v2803_v26  ;;  %v3291_v56 = vmul.f32 %v4582_v35, %v2805_v54  ;;  %v2807_v55 = vmax.f32 %v2673_v2, 0.0  ;;  %v2809_v47 = vmax.f32 %v2744_v10, 0.0 }
 0x17a   :  { %v2808_v48 = vmax.f32 %v2742_v42, 0.0  ;;  %v3319_v44 = vmul.f32 %v3302_v51, %v2806_v23  ;;  %v4583_v12 = vrot.slane %v4049_v40, %v3732_v7  ;;  %v4584_v13 = vrot.slane %v4049_v40, %v3735_v8 }
 0x17b   :  { %v3293_v28 = vadd.f32 %v3289_v50, %v3262_v39  ;;  %v3295_v33 = vadd.f32 %v3291_v56, %v3264_v20  ;;  %v4585_v16 = vrot.slane %v4049_v40, %v3738_v0  ;;  %v3542_v62 = vmov 1983009808  }
 0x17c   :  { %v3321_v41 = vmul.f32 %v4583_v12, %v2808_v48  ;;  %v3320_v1 = vmul.f32 %v4584_v13, %v2807_v55  ;;  %v3323_v38 = vadd.f32 %v3319_v44, %v3292_v5  ;;  %v3358_v24 = vunpack.c.l.s4 %v3542_v62 }
 0x17d   :  { %v3322_v21 = vmul.f32 %v4585_v16, %v2809_v47 }
 0x17e   :  { %v3325_v9 = vadd.f32 %v3321_v41, %v3294_v63  ;;  %v3324_v59 = vadd.f32 %v3320_v1, %v3293_v28  ;;  %v3413_v19 = vmul.f32 -1.442695, %v3323_v38  ;;  %v3359_v14 = vunpack.c.0.s8 %v3358_v24 }
 0x17f   :  { %v3326_v11 = vadd.f32 %v3322_v21, %v3295_v33 }
 0x180   :  { %v3415_v57 = vmul.f32 -1.442695, %v3325_v9  ;;  %v3414_v6 = vmul.f32 -1.442695, %v3324_v59  ;;  %3425 = vpow2.f32 %v3413_v19  ;;  %v3362_v30 = vsub.s32 %v3359_v14, %v3726_v4 }
 0x181   :  { %v3416_v51 = vmul.f32 -1.442695, %v3326_v11 }
 0x182   :  { %3427 = vpow2.f32 %v3415_v57 }
 0x183   :  { %3429 = vpow2.f32 %v3414_v6 }
 0x184   :  { %3431 = vpow2.f32 %v3416_v51 }
 0x18a   :  { %v3426_v7 = vpop.eup %3425 }
 0x18b   :  { %v3339_v8 = vadd.f32 1.0, %v3426_v7 }
 0x18c   :  { %v3428_v36 = vpop.eup %3427 }
 0x18d   :  { %v3430_v53 = vpop.eup %3429  ;;  %v3341_v60 = vadd.f32 1.0, %v3428_v36  ;;  %3433 = vrcp.f32 %v3339_v8 }
 0x18e   :  { %v3432_v25 = vpop.eup %3431  ;;  %v3340_v0 = vadd.f32 1.0, %v3430_v53 }
 0x18f   :  { %3435 = vrcp.f32 %v3341_v60  ;;  %v3342_v40 = vadd.f32 1.0, %v3432_v25 }
 0x190   :  { %3437 = vrcp.f32 %v3340_v0 }
 0x191   :  { %3439 = vrcp.f32 %v3342_v40 }
 0x197   :  { %v3434_v37 = vpop.eup %3433 }
 0x199   :  { %v3436_v27 = vpop.eup %3435 }
 0x19a   :  { %v3438_v31 = vpop.eup %3437 }
 0x19b   :  { %v3440_v61 = vpop.eup %3439  ;;  %v3355_v49 = vcombine.low %v3434_v37, %v3438_v31 }
 0x19c   :  { %v3356_v34 = vcombine.low %v3436_v27, %v3440_v61 }
 0x19d   :  { %v3363_v39 = vrot.slane %v3355_v49, %v3362_v30 }
 0x19e   :  { %v3370_v20 = vrot.slane %v3356_v34, %v3362_v30 }
 0x1a0   :  { %v3371_v26 = vcombine.low %v3363_v39, %v3370_v20 }
 0x1a2   :  { %3373 = vst [vmem:[%s4474_s5] sm:$0xff] %v3371_v26 }
 0x1a3   :  { %3378 = vsyncpa [#allocation3], 1 }
 0x1a4   :  { %3379 = vsyncpa [#allocation5], 1 }
 0x1a5   :  { %3380 = vsyncpa [#allocation8], 1 }

</bundles_post_ra>
